<compile_context>
chip_gen: v5e
topology: v5e:2x2
jax: 0.10.0
libtpu: 0.0.40
codegen_flags: <defaults>
</compile_context>

<pallas_src>
import functools
import math

import jax
import jax.numpy as jnp
from jax import lax
from jax.experimental import pallas as pl
from jax.experimental.pallas import tpu as pltpu


# ----------------------------------------------------------------------------- helpers
def _round_up(x, m):
    return ((x + m - 1) // m) * m


def _pick_tile(dim, preferred, unit, split_for_cores=False):
    """Multiple of `unit`, <= preferred and <= round_up(dim, unit).
    If split_for_cores, also cap at ~dim/2 so a "parallel" grid axis gets at
    least two tiles (feeds both v7x TensorCores)."""
    t = min(preferred, _round_up(dim, unit))
    if split_for_cores and dim > unit:
        t = min(t, max(unit, _round_up(-(-dim // 2), unit)))
    return max(unit, (t // unit) * unit)


def _vmem_limit_bytes():
    phys = 64 * 1024 * 1024                      # conservative default (v7x-sized)
    try:
        info = pltpu.get_tpu_info()
        phys = int(getattr(info, "vmem_capacity_bytes", phys))
    except Exception:
        pass
    # leave double-buffer headroom: 48 MiB on 64 MiB parts, 96 MiB on 128 MiB parts
    return min(96 * 1024 * 1024, phys * 3 // 4)


# ----------------------------------------------------------------------------- in-kernel helpers
def _fold_into(out_ref, vals, width, acc_w):
    """Fold a (tr, width) tile into the narrow (tr, acc_w) resident accumulator
    with static lane-aligned slab adds (no XLU)."""
    folded = vals[:, 0:acc_w]
    for s in range(1, width // acc_w):
        folded = folded + vals[:, s * acc_w:(s + 1) * acc_w]
    out_ref[...] += folded


def _masked_accumulate(vals, accumulate, row_true, col_true, tr, tc):
    """Accumulate `vals` (tr, tc); apply the validity mask only on ragged
    boundary tiles (interior tiles pay zero mask cost)."""
    i = pl.program_id(0)
    j = pl.program_id(1)
    ragged_rows = (row_true % tr) != 0
    ragged_cols = (col_true % tc) != 0

    if not (ragged_rows or ragged_cols):
        accumulate(vals)                         # interior fast path
        return

    conds = []
    if ragged_rows:
        conds.append(i == pl.num_programs(0) - 1)
    if ragged_cols:
        conds.append(j == pl.num_programs(1) - 1)
    is_edge = conds[0]
    for c in conds[1:]:
        is_edge = jnp.logical_or(is_edge, c)

    @pl.when(jnp.logical_not(is_edge))
    def _():
        accumulate(vals)

    @pl.when(is_edge)
    def _():
        valid = None
        if ragged_rows:
            row = i * tr + lax.broadcasted_iota(jnp.int32, (tr, tc), 0)
            valid = row < row_true
        if ragged_cols:
            col = j * tc + lax.broadcasted_iota(jnp.int32, (tr, tc), 1)
            cm = col < col_true
            valid = cm if valid is None else jnp.logical_and(valid, cm)
        # overhang data is garbage (possibly inf/nan) -> select zeroes it
        accumulate(jnp.where(valid, vals, 0.0))


# ----------------------------------------------------------------------------- kernel A: BCE
def _bce_sum_kernel(b_true, n_true, tb, tn, acc_w, x_ref, t_ref, out_ref):
    j = pl.program_id(1)                         # label tile = reduction axis

    @pl.when(j == 0)
    def _():
        out_ref[...] = jnp.zeros_like(out_ref)

    x = x_ref[...].astype(jnp.float32)
    t = t_ref[...].astype(jnp.float32)
    bce = jnp.maximum(x, 0.0) - x * t + jnp.log1p(jnp.exp(-jnp.abs(x)))

    _masked_accumulate(bce, lambda v: _fold_into(out_ref, v, tn, acc_w),
                       b_true, n_true, tb, tn)


# ----------------------------------------------------------------------------- kernel B: proba reg
def _prob_sum_kernel(b_true, p_true, tb, tp, acc_w, plg_ref, clg_ref, out_ref):
    k = pl.program_id(1)                         # pair tile = reduction axis

    @pl.when(k == 0)
    def _():
        out_ref[...] = jnp.zeros_like(out_ref)

    xp = plg_ref[...].astype(jnp.float32)
    xc = clg_ref[...].astype(jnp.float32)
    ep = jnp.exp(-jnp.abs(xp))
    ec = jnp.exp(-jnp.abs(xc))
    rp = 1.0 / (1.0 + ep)                        # exact sigmoid (stable form)
    rc = 1.0 / (1.0 + ec)
    sig_p = jnp.where(xp >= 0.0, rp, ep * rp)
    sig_c = jnp.where(xc >= 0.0, rc, ec * rc)
    viol = jnp.maximum(sig_c - sig_p, 0.0)

    _masked_accumulate(viol, lambda v: _fold_into(out_ref, v, tp, acc_w),
                       b_true, p_true, tb, tp)


# ----------------------------------------------------------------------------- wrapper
def match_loss(logits, targets, recursive_params, recursive_relation,
               recursive_penalty=1e-3, proba_penalty=1e-2):
    """Pallas implementation of MATCHLoss.forward.

    logits  : (B, N) float32 / bfloat16
    targets : (B, N) float32 / bfloat16 (0/1; bf16 recommended — exact & half the bytes)
    recursive_params   : (N, H) float32 classifier weights
    recursive_relation : dict {parent_label_id: [child_label_ids]}
    """
    logits = jnp.asarray(logits)
    targets = jnp.asarray(targets)
    recursive_params = jnp.asarray(recursive_params, jnp.float32)

    B, N = logits.shape
    vmem_bytes = _vmem_limit_bytes()

    # --------------------------- BCE term (cdiv grid on raw arrays, no wrapper pad)
    TB = _pick_tile(B, 256, 16, split_for_cores=True)   # 16: bf16 sublane packing
    TN = _pick_tile(N, 2048, 128)
    nb, nn = pl.cdiv(B, TB), pl.cdiv(N, TN)
    acc_w = math.gcd(TN, 512)                            # narrow lane-aligned accumulator

    bce_partial = pl.pallas_call(
        functools.partial(_bce_sum_kernel, B, N, TB, TN, acc_w),
        out_shape=jax.ShapeDtypeStruct((nb * TB, acc_w), jnp.float32),
        grid=(nb, nn),
        in_specs=[pl.BlockSpec((TB, TN), lambda i, j: (i, j)),
                  pl.BlockSpec((TB, TN), lambda i, j: (i, j))],
        out_specs=pl.BlockSpec((TB, acc_w), lambda i, j: (i, 0)),
        compiler_params=pltpu.CompilerParams(
            dimension_semantics=("parallel", "arbitrary"),
            vmem_limit_bytes=vmem_bytes),
    )(logits, targets)

    loss = jnp.sum(bce_partial) / float(B * N)           # global mean, once, in the wrapper

    # --------------------------- (parent, child) pair terms
    parent_idx, child_idx = [], []
    for p, children in recursive_relation.items():
        for c in children:
            parent_idx.append(int(p))
            child_idx.append(int(c))
    P = len(parent_idx)
    if P == 0:                                           # empty-hierarchy guard
        return loss

    parent_idx = jnp.asarray(parent_idx, jnp.int32)
    child_idx = jnp.asarray(child_idx, jnp.int32)

    # Recursive-weight regularizer: trivial fused gather/elementwise/reduce — XLA
    # already runs this at the HBM roofline, so it stays out of the Pallas path.
    dw = (jnp.take(recursive_params, parent_idx, axis=0)
          - jnp.take(recursive_params, child_idx, axis=0))
    rec_reg = 0.5 * jnp.sum(dw * dw)

    # Probability regularizer: batch-tiled ("parallel") x pair-tiled ("arbitrary").
    # TODO(synk): replace these XLA column gathers with a scalar-prefetch (SMEM index)
    # in-kernel gather to remove the duplicated O(B*P) HBM round trip.
    parent_logits = jnp.take(logits, parent_idx, axis=1)   # (B, P)
    child_logits = jnp.take(logits, child_idx, axis=1)     # (B, P)

    TB2 = _pick_tile(B, 256, 8, split_for_cores=True)
    TP = _pick_tile(P, 2048, 128)
    nb2, np2 = pl.cdiv(B, TB2), pl.cdiv(P, TP)
    acc_w2 = math.gcd(TP, 512)

    prob_partial = pl.pallas_call(
        functools.partial(_prob_sum_kernel, B, P, TB2, TP, acc_w2),
        out_shape=jax.ShapeDtypeStruct((nb2 * TB2, acc_w2), jnp.float32),
        grid=(nb2, np2),
        in_specs=[pl.BlockSpec((TB2, TP), lambda i, k: (i, k)),
                  pl.BlockSpec((TB2, TP), lambda i, k: (i, k))],
        out_specs=pl.BlockSpec((TB2, acc_w2), lambda i, k: (i, 0)),
        compiler_params=pltpu.CompilerParams(
            dimension_semantics=("parallel", "arbitrary"),
            vmem_limit_bytes=vmem_bytes),
    )(parent_logits, child_logits)

    prob_reg = jnp.sum(prob_partial)
    return loss + recursive_penalty * rec_reg + proba_penalty * prob_reg


# ----------------------------------------------------------------------------- reference
def match_loss_ref(logits, targets, recursive_params, recursive_relation,
                   recursive_penalty=1e-3, proba_penalty=1e-2):
    """Pure-JAX reference for sanity checking (mirrors the PyTorch module)."""
    x = logits.astype(jnp.float32)
    t = targets.astype(jnp.float32)
    bce = jnp.mean(jnp.maximum(x, 0.0) - x * t + jnp.log1p(jnp.exp(-jnp.abs(x))))
    rec = 0.0
    prob = 0.0
    sig = jax.nn.sigmoid(x)
    for p, children in recursive_relation.items():
        if not children:
            continue
        cidx = jnp.asarray(children)
        cw = recursive_params[cidx]
        pw = recursive_params[p][None, :].repeat(len(children), axis=0)
        rec = rec + 0.5 * jnp.sum((pw - cw) ** 2)
        cp = sig[:, cidx]
        pp = sig[:, p:p + 1].repeat(len(children), axis=1)
        prob = prob + jnp.sum(jax.nn.relu(cp - pp))
    return bce + recursive_penalty * rec + proba_penalty * prob


if __name__ == "__main__":
    def run_case(B, N, H, relation, key):
        k1, k2, k3 = jax.random.split(key, 3)
        logits = jax.random.normal(k1, (B, N), dtype=jnp.float32)
        # targets as bf16: 0/1 exactly representable, halves HBM bytes for the BCE kernel
        targets = (jax.random.uniform(k2, (B, N)) > 0.5).astype(jnp.bfloat16)
        params = jax.random.normal(k3, (N, H), dtype=jnp.float32) * 0.5

        out = match_loss(logits, targets, params, relation,
                         recursive_penalty=1e-3, proba_penalty=1e-2)
        out = jax.block_until_ready(out)

        ref = match_loss_ref(logits, targets, params, relation,
                             recursive_penalty=1e-3, proba_penalty=1e-2)
        assert jnp.allclose(out, ref, rtol=1e-3, atol=1e-3), (out, ref)

    key = jax.random.PRNGKey(0)
    ka, kb = jax.random.split(key)

    # Case 1: small, deliberately non-multiples of (8, 128) -> ragged edge-mask path.
    rel1 = {0: [3, 4, 5], 1: [6, 7], 2: [8, 9, 10],
            3: [11, 12], 6: [13, 14, 15], 8: [16, 17]}
    run_case(4, 24, 48, rel1, ka)

    # Case 2: tile-aligned -> mask-free interior fast path and a 2-tile
    # "parallel" batch axis (exercises the megacore split used on v7x).
    rel2 = {p: list(range(32 + 5 * p, 32 + 5 * p + 5)) for p in range(32)}
    run_case(64, 256, 32, rel2, kb)

    print("KERNEL_OK")
</pallas_src>

<mosaic_0001>
module attributes {stable_mosaic.version = 11 : i64} {
  func.func @_bce_sum_kernel(%arg0: i32, %arg1: i32, %arg2: memref<16x128xf32, #tpu.memory_space<vmem>>, %arg3: memref<16x128xbf16, #tpu.memory_space<vmem>>, %arg4: memref<16x128xf32, #tpu.memory_space<vmem>>) attributes {dimension_semantics = [#tpu.dimension_semantics<parallel>, #tpu.dimension_semantics<arbitrary>], iteration_bounds = array<i64: 1, 1>, scalar_prefetch = 0 : i64, scratch_operands = 0 : i64, tpu.core_type = #tpu.core_type<tc>, window_params = [{transform_indices = @transform_0, window_bounds = array<i64: 16, 128>}, {transform_indices = @transform_1, window_bounds = array<i64: 16, 128>}, {transform_indices = @transform_2, window_bounds = array<i64: 16, 128>}]} {
    %c0_i32 = arith.constant 0 : i32
    %0 = arith.cmpi eq, %arg1, %c0_i32 : i32
    %1 = arith.extui %0 : i1 to i32
    %c0_i32_0 = arith.constant 0 : i32
    %2 = arith.cmpi ne, %1, %c0_i32_0 : i32
    scf.if %2 {
      %cst_9 = arith.constant 0.000000e+00 : f32
      %24 = vector.broadcast %cst_9 : f32 to vector<16x128xf32>
      %c0_10 = arith.constant 0 : index
      %c0_11 = arith.constant 0 : index
      %25 = vector.load %arg4[%c0_10, %c0_11] : memref<16x128xf32, #tpu.memory_space<vmem>>, vector<16x128xf32>
      tpu.vector_store %arg4[%c0_10, %c0_11], %24 {strides = array<i32>} : memref<16x128xf32, #tpu.memory_space<vmem>>, vector<16x128xf32>,
    } else {
    }
    %c0 = arith.constant 0 : index
    %c0_1 = arith.constant 0 : index
    %3 = vector.load %arg2[%c0, %c0_1] : memref<16x128xf32, #tpu.memory_space<vmem>>, vector<16x128xf32>
    %c0_2 = arith.constant 0 : index
    %c0_3 = arith.constant 0 : index
    %4 = vector.load %arg3[%c0_2, %c0_3] : memref<16x128xbf16, #tpu.memory_space<vmem>>, vector<16x128xbf16>
    %5 = arith.extf %4 : vector<16x128xbf16> to vector<16x128xf32>
    %cst = arith.constant 0.000000e+00 : f32
    %6 = vector.broadcast %cst : f32 to vector<16x128xf32>
    %7 = arith.maximumf %3, %6 : vector<16x128xf32>
    %8 = arith.mulf %3, %5 : vector<16x128xf32>
    %9 = arith.subf %7, %8 : vector<16x128xf32>
    %10 = math.absf %3 : vector<16x128xf32>
    %cst_4 = arith.constant 0.000000e+00 : f32
    %11 = vector.broadcast %cst_4 : f32 to vector<16x128xf32>
    %12 = arith.subf %11, %10 : vector<16x128xf32>
    %13 = math.exp %12 : vector<16x128xf32>
    %14 = math.log1p %13 : vector<16x128xf32>
    %15 = arith.addf %9, %14 : vector<16x128xf32>
    %c0_i32_5 = arith.constant 0 : i32
    %16 = arith.cmpi eq, %arg0, %c0_i32_5 : i32
    %c0_i32_6 = arith.constant 0 : i32
    %17 = arith.cmpi eq, %arg1, %c0_i32_6 : i32
    %18 = arith.ori %16, %17 : i1
    %true = arith.constant true
    %19 = arith.xori %18, %true : i1
    %20 = arith.extui %19 : i1 to i32
    %c0_i32_7 = arith.constant 0 : i32
    %21 = arith.cmpi ne, %20, %c0_i32_7 : i32
    scf.if %21 {
      %c0_9 = arith.constant 0 : index
      %c0_10 = arith.constant 0 : index
      %24 = vector.load %arg4[%c0_9, %c0_10] : memref<16x128xf32, #tpu.memory_space<vmem>>, vector<16x128xf32>
      %25 = arith.addf %24, %15 : vector<16x128xf32>
      %c0_11 = arith.constant 0 : index
      %c0_12 = arith.constant 0 : index
      %26 = vector.load %arg4[%c0_11, %c0_12] : memref<16x128xf32, #tpu.memory_space<vmem>>, vector<16x128xf32>
      tpu.vector_store %arg4[%c0_11, %c0_12], %25 {strides = array<i32>} : memref<16x128xf32, #tpu.memory_space<vmem>>, vector<16x128xf32>,
    } else {
    }
    %22 = arith.extui %18 : i1 to i32
    %c0_i32_8 = arith.constant 0 : i32
    %23 = arith.cmpi ne, %22, %c0_i32_8 : i32
    scf.if %23 {
      %c16_i32 = arith.constant 16 : i32
      %24 = arith.muli %arg0, %c16_i32 : i32
      %25 = tpu.iota {dimensions = array<i32: 0>} : vector<16x128xi32>
      %26 = vector.broadcast %24 : i32 to vector<16x128xi32>
      %27 = arith.addi %26, %25 : vector<16x128xi32>
      %c4_i32 = arith.constant 4 : i32
      %28 = vector.broadcast %c4_i32 : i32 to vector<16x128xi32>
      %29 = arith.cmpi slt, %27, %28 : vector<16x128xi32>
      %c128_i32 = arith.constant 128 : i32
      %30 = arith.muli %arg1, %c128_i32 : i32
      %31 = tpu.iota {dimensions = array<i32: 1>} : vector<16x128xi32>
      %32 = vector.broadcast %30 : i32 to vector<16x128xi32>
      %33 = arith.addi %32, %31 : vector<16x128xi32>
      %c24_i32 = arith.constant 24 : i32
      %34 = vector.broadcast %c24_i32 : i32 to vector<16x128xi32>
      %35 = arith.cmpi slt, %33, %34 : vector<16x128xi32>
      %36 = arith.andi %29, %35 : vector<16x128xi1>
      %cst_9 = arith.constant 0.000000e+00 : f32
      %37 = vector.broadcast %cst_9 : f32 to vector<16x128xf32>
      %38 = arith.select %36, %15, %37 : vector<16x128xi1>, vector<16x128xf32>
      %c0_10 = arith.constant 0 : index
      %c0_11 = arith.constant 0 : index
      %39 = vector.load %arg4[%c0_10, %c0_11] : memref<16x128xf32, #tpu.memory_space<vmem>>, vector<16x128xf32>
      %40 = arith.addf %39, %38 : vector<16x128xf32>
      %c0_12 = arith.constant 0 : index
      %c0_13 = arith.constant 0 : index
      %41 = vector.load %arg4[%c0_12, %c0_13] : memref<16x128xf32, #tpu.memory_space<vmem>>, vector<16x128xf32>
      tpu.vector_store %arg4[%c0_12, %c0_13], %40 {strides = array<i32>} : memref<16x128xf32, #tpu.memory_space<vmem>>, vector<16x128xf32>,
    } else {
    }
    return
  }
  func.func @transform_0(%arg0: i32, %arg1: i32) -> (i32, i32) {
    %c0_i32 = arith.constant 0 : i32
    return %arg0, %arg1 : i32, i32
  }
  func.func @transform_1(%arg0: i32, %arg1: i32) -> (i32, i32) {
    %c0_i32 = arith.constant 0 : i32
    return %arg0, %arg1 : i32, i32
  }
  func.func @transform_2(%arg0: i32, %arg1: i32) -> (i32, i32) {
    %c0_i32 = arith.constant 0 : i32
    %c0_i32_0 = arith.constant 0 : i32
    return %arg0, %c0_i32 : i32, i32
  }
}

</mosaic_0001>

<bundles_post_ra>
// kernel: tpu_custom_call.1
= control target key start
LH: loop header
LB: loop body
LE: loop exit
PB: predicated region body
PF: predicated region fallthrough
CT: control target
= control target key end

     0   :  { %7 = vsyncpa [#allocation3], 0  ;;  %s294_s0 = inlined_call_operand.hbm [shape: f32[4,24], index: 0, kind: input, shape index: {}]   ;;  %s295_s1 = inlined_call_operand.hbm [shape: bf16[4,24], index: 1, kind: input, shape index: {}]   ;;  %s296_s2 = inlined_call_operand.hbm [shape: f32[16,128], index: 2, kind: output, shape index: {}]  }
   0x1   :  { %8 = vsyncpa [#allocation6], 0 }
   0x2   :  { %9 = vsyncpa [#allocation4], 0 }
   0x3   :  { %13 = vsyncadd [#allocation3], 192  ;;  %s14_s11 = sshll.u32 %s294_s0, 4  ;;  %s260_s12 = smov [#allocation2]   ;;  %s15_s11 = int_to_ptr.hbm [resolvable:$true] %s14_s11 }
   0x4   :  { %s16_s13 = sshll.u32 %s260_s12, 4  ;;  %s261_s14 = smov 64   ;;  %s17_s13 = int_to_ptr.vmem [resolvable:$true] %s16_s13 }
   0x5   :  { %s262_s15 = smov 4  }
   0x6   :  { %22 = dma.hbm_to_vmem [thread:$0]  %s15_s11, 64, %s17_s13, [#allocation3], %s261_s14, %s261_s14, %s262_s15  }
   0x7   :  { %26 = vsyncadd [#allocation6], 96  ;;  %s27_s18 = sshll.u32 %s295_s1, 4  ;;  %s263_s19 = smov [#allocation5]   ;;  %s28_s18 = int_to_ptr.hbm [resolvable:$true] %s27_s18 }
   0x8   :  { %s29_s20 = sshll.u32 %s263_s19, 4  ;;  %s264_s21 = smov 32   ;;  %s30_s20 = int_to_ptr.vmem [resolvable:$true] %s29_s20 }
   0x9   :  { %s265_s22 = smov 2  }
   0xa   :  { %35 = dma.hbm_to_vmem [thread:$0]  %s28_s18, 32, %s30_s20, [#allocation6], %s264_s21, %s264_s21, %s265_s22  }
   0xb   :  { %254 = dma.done.wait [#allocation3], 256  }
   0xc   :  { %255 = vsyncadd [#allocation3], 4294967040 }
   0xd   :  { %256 = dma.done.wait [#allocation6], 128  }
   0xe   :  { %257 = vsyncadd [#allocation6], 4294967168  ;;  %v266_v0 = vmov 0.0   ;;  %v52_v1 = vld [vmem:[#allocation5] sm:$0x3]  ;;  %v50_v3 = vld [vmem:[#allocation2] sm:$0xff]  ;;  %v115_v10 = vlaneseq }
   0xf   :  { %138 = vst [vmem:[#allocation7 + $0x8] sm:$0xff] %v266_v0  ;;  %v53_v2 = vld [vmem:[#allocation5 + $0x2] sm:$0x3]  ;;  %v56_v4 = vunpack.c.l.bf16 %v52_v1  ;;  %v81_v6 = vand.u32 2147483647, %v50_v3  ;;  %v60_v16 = vmax.f32 %v50_v3, 0.0 }
  0x10   :  { %v57_v5 = vunpack.c.l.bf16 %v53_v2  ;;  %v116_v15 = vshrl.u32 %v115_v10, 7  ;;  %v125_v19 = vand.u32 127, %v115_v10  ;;  %s267_s0 = smov [#allocation7]   ;;  %s154_s25 = sshll.u32 %s296_s2, 4  ;;  %s155_s25 = int_to_ptr.hbm [resolvable:$true] %s154_s25 }
  0x11   :  { %66 = vst [vmem:[#allocation1] ss:$2 sm:$0xff] %v56_v4  ;;  %v83_v7 = vsub.f32 0.0, %v81_v6  ;;  %s152_s1 = sshll.u32 %s267_s0, 4  ;;  %s268_s26 = smov 128   ;;  %s153_s1 = int_to_ptr.vmem [resolvable:$true] %s152_s1 }
  0x12   :  { %68 = vst [vmem:[#allocation1 + $0x1] ss:$2 sm:$0xff] %v57_v5  ;;  %vm121_vm1 = vcmp.lt.s32.totalorder %v116_v15, 4  ;;  %vm128_vm2 = vcmp.lt.s32.totalorder %v125_v19, 24  ;;  %s269_s27 = smov 8  }
  0x13   :  { %v85_v8 = vmul.f32 1.442695, %v83_v7  ;;  %vm129_vm3 = vmand %vm121_vm1, %vm128_vm2 }
  0x15   :  { %178 = vpow2.f32 %v85_v8 }
  0x19   :  { %v73_v13 = vld.sshfl [vmem:[#allocation1] sm:$0xff pattern:$0x75316420] }
  0x1a   :  { %v77_v17 = vmul.f32 %v73_v13, %v50_v3 }
  0x1b   :  { %v179_v9 = vpop.eup %178 }
  0x1c   :  { %v89_v11 = vadd.f32 1.0, %v179_v9  ;;  %v92_v12 = vmul.f32 -0.5, %v179_v9  ;;  %v95_v18 = vand.u32 2147483647, %v179_v9  ;;  %v79_v22 = vsub.f32 %v60_v16, %v77_v17 }
  0x1e   :  { %180 = vlog2.f32 %v89_v11  ;;  %v93_v14 = vadd.f32 1.0, %v92_v12  ;;  %vm96_vm0 = vcmp.lt.f32.partialorder %v95_v18, 0.0004427343 }
  0x20   :  { %v94_v20 = vmul.f32 %v179_v9, %v93_v14 }
  0x24   :  { %v181_v21 = vpop.eup %180 }
  0x25   :  { %v91_v23 = vmul.f32 0.6931472, %v181_v21 }
  0x27   :  { %v97_v24 = vsel %vm96_vm0, %v94_v20, %v91_v23 }
  0x28   :  { %v107_v25 = vadd.f32 %v97_v24, %v79_v22 }
  0x2a   :  { %v131_v26 = vsel %vm129_vm3, %v107_v25, 0.0 }
  0x2b   :  { %137 = vst [vmem:[#allocation7] sm:$0xff] %v131_v26 }
  0x2c   :  { %160 = dma.vmem_to_hbm [thread:$0]  %s153_s1, 256, %s155_s25, [#allocation4], %s268_s26, %s268_s26, %s269_s27  }
  0x2d   :  { %258 = dma.done.wait [#allocation4], 256  }
  0x2e   :  { %259 = vsyncadd [#allocation4], 4294967040 }
  0x2f   :  { %165 = vsyncpa [#allocation3], 1 }
  0x30   :  { %166 = vsyncpa [#allocation6], 1 }
  0x31   :  { %167 = vsyncpa [#allocation4], 1 }

</bundles_post_ra>
